<compile_context>
chip_gen: v7x
topology: tpu7x:2x2x1
jax: 0.10.0
libtpu: 0.0.40
codegen_flags: <defaults>
</compile_context>

<pallas_src>
import functools

import jax
import jax.numpy as jnp
from jax.experimental import pallas as pl
from jax.experimental.pallas import tpu as pltpu


# ---------------------------------------------------------------------------
# Kernel
# ---------------------------------------------------------------------------
def _ln_kernel(x_ref, g_ref, o_ref, *, eps):
    # x_ref: (TB, C, TL); g_ref: (1, C, 1) f32; normalize over channels (axis=1).
    x = x_ref[...].astype(jnp.float32)
    mean = jnp.mean(x, axis=1, keepdims=True)            # (TB, 1, TL)
    x = x - mean                                         # reuse: one f32 temp live
    var = jnp.mean(x * x, axis=1, keepdims=True)         # biased (unbiased=False)
    o_ref[...] = (x * jax.lax.rsqrt(var + eps) * g_ref[...]).astype(o_ref.dtype)


# ---------------------------------------------------------------------------
# Tile sizing (generation-aware, byte-based)
# ---------------------------------------------------------------------------
def _vmem_capacity_bytes():
    try:
        return int(pltpu.get_tpu_info().vmem_capacity_bytes)
    except Exception:  # pragma: no cover - conservative fallback (v7x per-TC)
        return 64 * 1024 * 1024


def _largest_divisor_leq(n, cap):
    """Largest divisor of n that is <= cap (>= 1)."""
    cap = max(1, min(int(cap), int(n)))
    for d in range(cap, 0, -1):
        if n % d == 0:
            return d
    return 1


def _pick_tiles(B, C, L, dtype_bytes, budget_bytes):
    """Pick (TB, TL) block dims sized by bytes; prefer full-L contiguous slabs."""
    # Per-element working set: double-buffered input + output blocks in x's
    # dtype plus ~2 full-tile f32 temporaries live in the body.
    per_elem = 4 * dtype_bytes + 2 * 4
    budget_elems = max(budget_bytes // per_elem, 1)

    slab = C * L                                  # one contiguous (C, L) slab
    if slab <= budget_elems:
        # Grow along batch (keeps every DMA row a full contiguous slab); keep
        # TB an exact divisor of B so no partial blocks on the leading dim.
        tb = _largest_divisor_leq(B, budget_elems // slab)
        tl = L
    else:
        # One batch slab is already big: tile the lane (L) axis instead.
        tb = 1
        tl = int((budget_elems // C) // 128 * 128)
        tl = max(128, tl)
        tl = min(tl, L)

    # v7x megacore: make sure the parallel grid has >= 2 steps.
    if pl.cdiv(B, tb) * pl.cdiv(L, tl) < 2:
        if B >= 2:
            tb = _largest_divisor_leq(B, B // 2)          # >= 2 batch steps
        elif L > 128:
            tl = (-(-tl // 2) + 127) // 128 * 128         # >= 2 lane steps
        # else: array is tiny; a single step is fine.
    return int(tb), int(tl)


# ---------------------------------------------------------------------------
# Wrapper
# ---------------------------------------------------------------------------
def layernorm(x, g, eps=None, tiles=None):
    """x: (B, C, L); g: (1, C, 1). Matches the PyTorch LayerNorm.forward."""
    B, C, L = x.shape
    if eps is None:
        # Matches this module's spec (NOT nn.LayerNorm's defaults).
        eps = 1e-5 if x.dtype == jnp.float32 else 1e-3
    g32 = g.astype(jnp.float32)                   # cast once, stays resident
    dtype_bytes = jnp.dtype(x.dtype).itemsize

    vmem = _vmem_capacity_bytes()
    vmem_limit = (vmem * 3) // 4                  # 48 MiB (v7x) / 96 MiB (v5e,v6e)
    if tiles is None:
        tb, tl = _pick_tiles(B, C, L, dtype_bytes, vmem_limit // 2)
    else:
        tb, tl = tiles

    grid = (pl.cdiv(B, tb), pl.cdiv(L, tl))
    n_steps = grid[0] * grid[1]

    # Deepen prefetch only when blocks are small enough that DMA issue latency
    # between steps is exposed (and there are enough steps to benefit).
    x_spec_kwargs = {}
    if tb * C * tl * dtype_bytes < (1 << 20) and n_steps >= 4:
        x_spec_kwargs["pipeline_mode"] = pl.Buffered(3)

    return pl.pallas_call(
        functools.partial(_ln_kernel, eps=eps),
        out_shape=jax.ShapeDtypeStruct((B, C, L), x.dtype),
        grid_spec=pltpu.PrefetchScalarGridSpec(
            num_scalar_prefetch=0,
            grid=grid,
            in_specs=[
                pl.BlockSpec((tb, C, tl), lambda b, j: (b, 0, j), **x_spec_kwargs),
                pl.BlockSpec((1, C, 1), lambda b, j: (0, 0, 0)),
            ],
            out_specs=pl.BlockSpec((tb, C, tl), lambda b, j: (b, 0, j)),
        ),
        compiler_params=pltpu.CompilerParams(
            dimension_semantics=("parallel", "parallel"),
            vmem_limit_bytes=int(vmem_limit),
        ),
    )(x, g32)


# ---------------------------------------------------------------------------
# Pure-JAX reference
# ---------------------------------------------------------------------------
def layernorm_ref(x, g, eps=None):
    if eps is None:
        eps = 1e-5 if x.dtype == jnp.float32 else 1e-3
    x32 = x.astype(jnp.float32)
    mean = jnp.mean(x32, axis=1, keepdims=True)
    var = jnp.mean((x32 - mean) ** 2, axis=1, keepdims=True)
    return ((x32 - mean) * jax.lax.rsqrt(var + eps) * g.astype(jnp.float32)).astype(x.dtype)


if __name__ == "__main__":
    key = jax.random.PRNGKey(0)
    k1, k2, k3 = jax.random.split(key, 3)

    # 1) Small shape consistent with the module (batch=2, channels=4, length=16):
    #    exercises the full-slab batch-tiled path (no wrapper transposes,
    #    masked tail stores on the 16-lane slab, 2 parallel grid steps).
    B, C, L = 2, 4, 16
    x = jax.random.normal(k1, (B, C, L), dtype=jnp.float32)
    g = jnp.ones((1, C, 1), dtype=jnp.float32)   # nn.Parameter(torch.ones(1, dim, 1))
    out = jax.block_until_ready(layernorm(x, g))
    ref = layernorm_ref(x, g)
    assert out.shape == (B, C, L)
    assert jnp.allclose(out, ref, atol=1e-5, rtol=1e-5)

    # 2) Auto-tiled: full (C, L) slabs, batch split across both TensorCores.
    B2, C2, L2 = 2, 8, 384
    x2 = jax.random.normal(k2, (B2, C2, L2), dtype=jnp.float32)
    g2 = jnp.ones((1, C2, 1), dtype=jnp.float32)
    out2 = jax.block_until_ready(layernorm(x2, g2))
    ref2 = layernorm_ref(x2, g2)
    assert out2.shape == (B2, C2, L2)
    assert jnp.allclose(out2, ref2, atol=1e-5, rtol=1e-5)

    # 3) Forced lane tiling with a partial last lane tile (L=200, TL=128):
    #    validates masked tail stores on the lane axis.
    B3, C3, L3 = 1, 8, 200
    x3 = jax.random.normal(k3, (B3, C3, L3), dtype=jnp.float32)
    g3 = jnp.ones((1, C3, 1), dtype=jnp.float32)
    out3 = jax.block_until_ready(layernorm(x3, g3, tiles=(1, 128)))
    ref3 = layernorm_ref(x3, g3)
    assert out3.shape == (B3, C3, L3)
    assert jnp.allclose(out3, ref3, atol=1e-5, rtol=1e-5)

    print("KERNEL_OK")
</pallas_src>

<mosaic_0001>
module attributes {stable_mosaic.version = 11 : i64} {
  func.func @_ln_kernel(%arg0: i32, %arg1: i32, %arg2: memref<1x4x16xf32, #tpu.memory_space<vmem>>, %arg3: memref<1x4x1xf32, #tpu.memory_space<vmem>>, %arg4: memref<1x4x16xf32, #tpu.memory_space<vmem>>) attributes {dimension_semantics = [#tpu.dimension_semantics<parallel>, #tpu.dimension_semantics<parallel>], iteration_bounds = array<i64: 2, 1>, scalar_prefetch = 0 : i64, scratch_operands = 0 : i64, tpu.core_type = #tpu.core_type<tc>, window_params = [{transform_indices = @transform_0, window_bounds = array<i64: 1, 4, 16>}, {pipeline_mode = #tpu.pipeline_mode<synchronous>, transform_indices = @transform_1, window_bounds = array<i64: 1, 4, 1>}, {transform_indices = @transform_2, window_bounds = array<i64: 1, 4, 16>}]} {
    %c0 = arith.constant 0 : index
    %c0_0 = arith.constant 0 : index
    %c0_1 = arith.constant 0 : index
    %0 = vector.load %arg2[%c0, %c0_0, %c0_1] : memref<1x4x16xf32, #tpu.memory_space<vmem>>, vector<1x4x16xf32>
    %cst = arith.constant dense<0.000000e+00> : vector<1x16xf32>
    %1 = vector.multi_reduction <add>, %0, %cst [1] : vector<1x4x16xf32> to vector<1x16xf32>
    %2 = vector.shape_cast %1 : vector<1x16xf32> to vector<1x1x16xf32>
    %cst_2 = arith.constant 4.000000e+00 : f32
    %3 = vector.broadcast %cst_2 : f32 to vector<1x1x16xf32>
    %4 = arith.divf %2, %3 : vector<1x1x16xf32>
    %5 = vector.broadcast %4 : vector<1x1x16xf32> to vector<1x4x16xf32>
    %6 = arith.subf %0, %5 : vector<1x4x16xf32>
    %7 = arith.mulf %6, %6 : vector<1x4x16xf32>
    %cst_3 = arith.constant dense<0.000000e+00> : vector<1x16xf32>
    %8 = vector.multi_reduction <add>, %7, %cst_3 [1] : vector<1x4x16xf32> to vector<1x16xf32>
    %9 = vector.shape_cast %8 : vector<1x16xf32> to vector<1x1x16xf32>
    %cst_4 = arith.constant 4.000000e+00 : f32
    %10 = vector.broadcast %cst_4 : f32 to vector<1x1x16xf32>
    %11 = arith.divf %9, %10 : vector<1x1x16xf32>
    %cst_5 = arith.constant 9.99999974E-6 : f32
    %12 = vector.broadcast %cst_5 : f32 to vector<1x1x16xf32>
    %13 = arith.addf %11, %12 : vector<1x1x16xf32>
    %14 = math.rsqrt %13 : vector<1x1x16xf32>
    %15 = vector.broadcast %14 : vector<1x1x16xf32> to vector<1x4x16xf32>
    %16 = arith.mulf %6, %15 : vector<1x4x16xf32>
    %c0_6 = arith.constant 0 : index
    %c0_7 = arith.constant 0 : index
    %c0_8 = arith.constant 0 : index
    %17 = vector.load %arg3[%c0_6, %c0_7, %c0_8] : memref<1x4x1xf32, #tpu.memory_space<vmem>>, vector<1x4x1xf32>
    %18 = vector.broadcast %17 : vector<1x4x1xf32> to vector<1x4x16xf32>
    %19 = arith.mulf %16, %18 : vector<1x4x16xf32>
    %c0_9 = arith.constant 0 : index
    %c0_10 = arith.constant 0 : index
    %c0_11 = arith.constant 0 : index
    %20 = vector.load %arg4[%c0_9, %c0_10, %c0_11] : memref<1x4x16xf32, #tpu.memory_space<vmem>>, vector<1x4x16xf32>
    tpu.vector_store %arg4[%c0_9, %c0_10, %c0_11], %19 {strides = array<i32>} : memref<1x4x16xf32, #tpu.memory_space<vmem>>, vector<1x4x16xf32>,
    return
  }
  func.func @transform_0(%arg0: i32, %arg1: i32) -> (i32, i32, i32) {
    %c0_i32 = arith.constant 0 : i32
    %c0_i32_0 = arith.constant 0 : i32
    return %arg0, %c0_i32, %arg1 : i32, i32, i32
  }
  func.func @transform_1(%arg0: i32, %arg1: i32) -> (i32, i32, i32) {
    %c0_i32 = arith.constant 0 : i32
    %c0_i32_0 = arith.constant 0 : i32
    %c0_i32_1 = arith.constant 0 : i32
    %c0_i32_2 = arith.constant 0 : i32
    return %c0_i32, %c0_i32_0, %c0_i32_1 : i32, i32, i32
  }
  func.func @transform_2(%arg0: i32, %arg1: i32) -> (i32, i32, i32) {
    %c0_i32 = arith.constant 0 : i32
    %c0_i32_0 = arith.constant 0 : i32
    return %arg0, %c0_i32, %arg1 : i32, i32, i32
  }
}

</mosaic_0001>

<bundles_post_ra>
// kernel: tpu_custom_call.1
= control target key start
LH: loop header
LB: loop body
LE: loop exit
PB: predicated region body
PF: predicated region fallthrough
CT: control target
= control target key end

     0   :  { %7 = vsyncpa [#allocation3], 0  ;;  %s696_s0 = inlined_call_operand.hbm [shape: f32[2,4,16], index: 0, kind: input, shape index: {}]   ;;  %s697_s1 = inlined_call_operand.vmem [shape: f32[1,4,1], index: 1, kind: input, shape index: {}]   ;;  %s698_s2 = inlined_call_operand.hbm [shape: f32[2,4,16], index: 2, kind: output, shape index: {}]  }
   0x1   :  { %9 = vsyncpa [#allocation3 + $0x1], 0 }
   0x2   :  { %10 = vsyncpa [#allocation4], 0 }
   0x3   :  { %12 = vsyncpa [#allocation4 + $0x1], 0  ;;  %s514_s9 = smov 0   ;;  %s516_s10 = smov 0  }
   0x4   :  { %s518_s11 = smov 0   ;;  %s520_s12 = smov 0  }
   0x5   :  { %s522_s13 = smov 0   ;;  %s524_s14 = smov 0  }
   0x6 LB: > { %s303_s15 = sadd.s32 4294967295, %s494_s14   ;;  %s304_s16 = sadd.s32 4294967294, %s494_s14   ;;  %s494_s14 = sphi %s524_s14, %s18_s14   ;;  %s490_s13 = sphi %s522_s13, %s714_s13   ;;  %s486_s12 = sphi %s520_s12, %s713_s12   ;;  %s482_s11 = sphi %s518_s11, %s712_s11   ;;  %s478_s10 = sphi %s516_s10, %s711_s10   ;;  %s474_s9 = sphi %s514_s9, %s710_s9  }
   0x7   : > { %s30_s17 = sadd.s32 1, %s490_s13  ;;  %s39_s18 = sadd.s32 1, %s482_s11 }
   0x8   : > { %p32_p0 = scmp.ge.s32.totalorder %s30_s17, 2  ;;  %p46_p1 = scmp.ne.s32.totalorder %s482_s11, %s478_s10 }
   0x9   : > { %p47_p2 = scmp.eq.s32.totalorder %s494_s14, 0  ;;  %p52_p3 = scmp.ne.s32.totalorder %s478_s10, %s474_s9 }
   0xa   : > { %s716_s17 = smov (%p32_p0, %s30_s17), 0  ;;  %p53_p5 = scmp.eq.s32.totalorder %s303_s15, 0 }
   0xb   : > { %p555_p4 = por %p47_p2, %p46_p1  ;;  %s34_s20 = ssub.s32 %s490_s13, %s716_s17 }
   0xc   : > { %p99_p6 = scmp.eq.s32.totalorder %s303_s15, 1  ;;  %p37_p7 = scmp.eq.s32.totalorder %s34_s20, 0 }
   0xd   : > { %p561_p8 = por %p53_p5, %p52_p3  ;;  %p105_p10 = scmp.eq.s32.totalorder %s304_s16, 1 }
   0xe   : > { %p565_p9 = por %p99_p6, %p46_p1  ;;  %p328_p13 = scmp.lt.s32.totalorder %s494_s14, 2 }
   0xf   : > { %s570_s23 = scalar_select %p37_p7, %s482_s11, %s39_s18  }
  0x10   : > { %s702_s22 = scalar_select %p565_p9, 1, 0 }
  0x11   : > { %p572_p11 = por %p105_p10, %p52_p3  ;;  %s128_s25 = sand.u32 1, %s482_s11  }
  0x12   : > { %s307_s26 = sshll.u32 %s128_s25, 2  ;;  %s308_s27 = sshll.u32 %s490_s13, 6 }
  0x13   : > { %s703_s24 = scalar_select %p572_p11, 1, 0 }
  0x14   : > { %s583_s30 = scalar_lea.hbm %s696_s0, %s308_s27  ;;  %s132_s3 = scalar_lea.vmem [#allocation2], %s307_s26 }
  0x15   : > { %s140_s4 = sshll.u32 %s132_s3, 4  ;;  %p589_p0 = pnand %p328_p13, %p555_p4  ;;  %s585_s4 = int_to_ptr.vmem [resolvable:$true] %s140_s4 }
  0x16   : > { %s129_s6 = scalar_lea.sflag [#allocation3], %s128_s25  ;;  %s382_s7 = scalar_lea.hbm %s583_s30, 64 }
  0x17   : > { %p383_p3 = scmp.ne.s32.totalorder %s583_s30, %s382_s7  ;;  %p384_p5 = pneg %p589_p0 }
  0x18   : > { %s387_s16 = scalar_lea.hbm %s696_s0, 128  ;;  %p388_p4 = scmp.lt.u32.totalorder %s583_s30, %s696_s0 }
  0x19   : > { %p385_p6 = pnand %p384_p5, %p383_p3  ;;  %p389_p10 = scmp.lt.u32.totalorder %s387_s16, %s382_s7 }
  0x1a   : > { %p391_p12 = scmp.lt.u32.totalorder %s382_s7, %s583_s30 }
  0x1b   : > { %p386_p7 = pneg %p385_p6  ;;  %p390_p13 = por %p389_p10, %p388_p4 }
  0x1d   : > { %p392_p1 = por %p391_p12, %p390_p13 }
  0x1f   : > { %p393_p2 = pnand %p392_p1, %p386_p7 }
  0x21   : > { %396 = shalt.err (!%p393_p2)
}
  0x22   : > { %s397_s20 = scalar_lea.vmem %s585_s4, 64  ;;  %s496_s25 = smov [#allocation2]  }
  0x23   : > { %p398_p3 = scmp.ne.s32.totalorder %s585_s4, %s397_s20  ;;  %s402_s26 = sshll.u32 %s496_s25, 4  ;;  %s403_s26 = int_to_ptr.vmem [resolvable:$false] %s402_s26 }
  0x24   : > { %s404_s27 = scalar_lea.vmem %s403_s26, 128  ;;  %p405_p9 = scmp.lt.s32.totalorder %s585_s4, %s403_s26 }
  0x25   : > { %p400_p6 = pnand %p398_p3, %p384_p5  ;;  %p406_p4 = scmp.lt.s32.totalorder %s404_s27, %s397_s20 }
  0x27   : > { %p401_p11 = pneg %p400_p6  ;;  %p407_p10 = por %p406_p4, %p405_p9 }
  0x29   : > { %p408_p12 = pnand %p407_p10, %p401_p11 }
  0x2b   : > { %411 = shalt.err (!%p408_p12)
}
  0x2c   : > { %323 = dma.hbm_to_vmem [thread:$0]  (!%p589_p0), %s583_s30, 64, %s585_s4, %s129_s6  }
  0x2d   : > { %p705_p1 = scmp.lt.s32.totalorder %s494_s14, 3  ;;  %p706_p2 = scmp.ge.s32.totalorder %s494_s14, 1 }
  0x2f   : > { %p146_p5 = pnand %p706_p2, %p705_p1 }
  0x30   : > { %s625_s28 = sand.u32 (!%p146_p5), 1, %s478_s10  }
  0x31   : > { %149 = sbr.rel (%p146_p5) target bundleno = 203 (0xcb), region = 28  ;;  %s310_s29 = sshll.u32 (!%p146_p5), %s625_s28, 2 }
  0x32   : > { %s152_s3 = scalar_lea.sflag (!%p146_p5), [#allocation3], %s625_s28  ;;  %s155_s5 = scalar_lea.vmem (!%p146_p5), [#allocation2], %s310_s29 }
  0x38   : > { %465 = dma.done.wait (%p561_p8), %s152_s3, 64  }
  0x39   : > { %467 = vsyncadd (%p561_p8), %s152_s3, 4294967232  ;;  %v497_v0 = vmov 0   ;;  %v200_v1 = vld [vmem:[%s697_s1] sm:$0xf]  ;;  %vm177_vm0 = vcmask 125952   ;;  %s313_s21 = sshll.u32 %s486_s12, 6 }
  0x3a   : > { %379 = vset.pattern.permute.xlu0 %v497_v0  ;;  %v176_v2 = vld [vmem:[%s155_s5] sm:$0xf]  ;;  %s175_s6 = scalar_lea.vmem [#allocation5], %s310_s29  ;;  %s646_s16 = scalar_lea.hbm %s698_s2, %s313_s21 }
  0x3b   : > { %203 = vperm.xlu0 %379, %v200_v1   ;;  %v178_v3 = vsel %vm177_vm0, %v176_v2, 0.0  ;;  %s223_s7 = sshll.u32 %s175_s6, 4  ;;  %s209_s18 = scalar_lea.sflag [#allocation4], %s625_s28  ;;  %s648_s7 = int_to_ptr.vmem [resolvable:$true] %s223_s7 }
  0x3c   : > { %v179_v4 = vrot.slane %v178_v3, 4  ;;  %s412_s19 = scalar_lea.vmem %s648_s7, 64  ;;  %p707_p9 = scmp.ne.s32.totalorder %s702_s22, 0 }
  0x3d   : > { %p413_p8 = scmp.ne.s32.totalorder %s648_s7, %s412_s19  ;;  %s498_s12 = smov [#allocation5]  }
  0x3e   : > { %v180_v5 = vadd.f32 %v179_v4, %v178_v3  ;;  %s416_s20 = sshll.u32 %s498_s12, 4  ;;  %s417_s20 = int_to_ptr.vmem [resolvable:$false] %s416_s20 }
  0x3f   : > { %p414_p11 = pnand %p413_p8, %p707_p9  ;;  %s418_s25 = scalar_lea.vmem %s417_s20, 128 }
  0x40   : > { %v181_v6 = vrot.slane %v180_v5, 2  ;;  %p419_p7 = scmp.lt.s32.totalorder %s648_s7, %s417_s20  ;;  %p420_p13 = scmp.lt.s32.totalorder %s418_s25, %s412_s19 }
  0x41   : > { %p415_p0 = pneg %p414_p11 }
  0x42   : > { %v182_v7 = vadd.f32 %v181_v6, %v180_v5  ;;  %p421_p3 = por %p420_p13, %p419_p7 }
  0x44   : > { %v183_v8 = vrot.slane %v182_v7, 1  ;;  %p422_p6 = pnand %p421_p3, %p415_p0 }
  0x46   : > { %v184_v9 = vadd.f32 %v183_v8, %v182_v7 }
  0x48   : > { %v186_v10 = vmul.f32 0.25, %v184_v9 }
  0x4a   : > { %v187_v11 = vsub.f32 %v176_v2, %v186_v10 }
  0x4c   : > { %v188_v12 = vmul.f32 %v187_v11, %v187_v11 }
  0x4e   : > { %v189_v13 = vsel %vm177_vm0, %v188_v12, 0.0 }
  0x4f   : > { %v190_v14 = vrot.slane %v189_v13, 4 }
  0x51   : > { %v191_v15 = vadd.f32 %v190_v14, %v189_v13 }
  0x53   : > { %v192_v16 = vrot.slane %v191_v15, 2 }
  0x55   : > { %v193_v17 = vadd.f32 %v192_v16, %v191_v15 }
  0x57   : > { %v194_v18 = vrot.slane %v193_v17, 1 }
  0x59   : > { %v195_v19 = vadd.f32 %v194_v18, %v193_v17 }
  0x5b   : > { %v196_v20 = vmul.f32 0.25, %v195_v19 }
  0x5d   : > { %v197_v21 = vadd.f32 1e-05, %v196_v20 }
  0x5f   : > { %380 = vrsqrt.f32 %v197_v21 }
  0x69   : > { %v381_v22 = vpop.eup %380 }
  0x6a   : > { %v199_v23 = vmul.f32 %v381_v22, %v187_v11 }
  0xba   : > { %v204_v24 = vpop.permute.xlu0 %203 }
  0xbb   : > { %v206_v25 = vmul.f32 %v204_v24, %v199_v23 }
  0xbd   : > { %207 = vst.msk [vmem:[%s175_s6] sm:$0xf] %vm177_vm0, %v206_v25 }
  0xbe   : > { %425 = shalt.err (!%p422_p6)
}
  0xbf   : > { %s426_s26 = scalar_lea.hbm %s646_s16, 64  ;;  %s430_s29 = scalar_lea.hbm %s698_s2, 128 }
  0xc0   : > { %p427_p4 = scmp.ne.s32.totalorder %s646_s16, %s426_s26  ;;  %p431_p1 = scmp.lt.u32.totalorder %s646_s16, %s698_s2 }
  0xc1   : > { %p432_p2 = scmp.lt.u32.totalorder %s430_s29, %s426_s26  ;;  %p434_p8 = scmp.lt.u32.totalorder %s426_s26, %s646_s16 }
  0xc2   : > { %p428_p10 = pnand %p427_p4, %p707_p9 }
  0xc3   : > { %p433_p5 = por %p432_p2, %p431_p1 }
  0xc4   : > { %p429_p12 = pneg %p428_p10 }
  0xc5   : > { %p435_p11 = por %p434_p8, %p433_p5 }
  0xc7   : > { %p436_p0 = pnand %p435_p11, %p429_p12 }
  0xc9   : > { %439 = shalt.err (!%p436_p0)
}
  0xca   : > { %318 = dma.vmem_to_hbm [thread:$0]  (%p707_p9), %s648_s7, 64, %s646_s16, %s209_s18  }
  0xcb PF: > { %s235_s30 = sand.u32 1, %s474_s9   ;;  %p708_p7 = scmp.ne.s32.totalorder %s703_s24, 0 }
  0xcc   : > { %p709_p13 = scmp.ge.s32.totalorder %s494_s14, 2  ;;  %s236_s4 = scalar_lea.sflag [#allocation4], %s235_s30 }
  0xce   : > { %p325_p3 = pnand %p709_p13, %p708_p7 }
  0xd0   : > { %469 = dma.done.wait (!%p325_p3), %s236_s4, 64  }
  0xd1   : > { %471 = vsyncadd (!%p325_p3), %s236_s4, 4294967232  ;;  %s18_s14 = sadd.s32 1, %s494_s14   ;;  %s710_s9 = smov %s478_s10 }
  0xd2   : > { %p15_p6 = scmp.ge.s32.totalorder %s18_s14, 4   ;;  %s711_s10 = smov %s482_s11 }
  0xd3   : > { %s712_s11 = smov %s570_s23  ;;  %s713_s12 = smov %s490_s13 }
  0xd4   : > { %s714_s13 = smov %s716_s17  ;;  %17 = sbr.rel (!%p15_p6) target bundleno = 6 (0x6), region = 73 }
  0xdb   :  { %241 = vsyncpa [#allocation3], 1 }
  0xdc   :  { %243 = vsyncpa [#allocation3 + $0x1], 1 }
  0xdd   :  { %244 = vsyncpa [#allocation4], 1 }
  0xde   :  { %246 = vsyncpa [#allocation4 + $0x1], 1 }

</bundles_post_ra>
